<compile_context>
chip_gen: v5e
topology: v5e:2x2
jax: 0.10.0
libtpu: 0.0.40
codegen_flags: <defaults>
</compile_context>

<pallas_src>
import jax
import jax.numpy as jnp
from jax.experimental import pallas as pl
from jax.experimental.pallas import tpu as pltpu


def meteo_kernel(x_ref, w1_ref, w2_ref, b2_ref, w3_ref, b3_ref, o_ref):
    x = x_ref[...]                                               # (5, TB) bf16, row 4 == 1 (bias fold)

    # fc1 (bias folded into the matmul) + ReLU
    h1 = jnp.dot(w1_ref[...], x, preferred_element_type=jnp.float32)      # (128, TB) f32
    h1 = jnp.maximum(h1, 0.0).astype(jnp.bfloat16)

    # fc2 + bias + ReLU   (dropout == identity in eval mode)
    h2 = jnp.dot(w2_ref[...], h1, preferred_element_type=jnp.float32) + b2_ref[...]
    h2 = jnp.maximum(h2, 0.0).astype(jnp.bfloat16)               # (64, TB)

    # fc3 + bias; rows 3..7 are padding (zero weights, -1e9 bias -> exp() == 0)
    logits = jnp.dot(w3_ref[...], h2, preferred_element_type=jnp.float32) + b3_ref[...]  # (8, TB)

    # softmax over the class axis (PyTorch dim=1 == axis 0 in feature-major layout)
    m = jnp.max(logits, axis=0, keepdims=True)                   # (1, TB)
    e = jnp.exp(logits - m)                                      # (8, TB)
    denom = jnp.sum(e, axis=0, keepdims=True)
    o_ref[...] = e * pl.reciprocal(denom, approx=False)          # exact: rows sum to 1


def meteo_forward(x, params, *, tile_b=2048):
    """x: (B, 4) float32.  Returns softmax probabilities (B, 3)."""
    w1, b1, w2, b2, w3, b3 = params     # weights [out, in], biases [out, 1], all f32
    B, F = x.shape
    assert F == 4

    # Fold b1 into w1 (ones row is appended to the activation below).
    w1a = jnp.concatenate([w1, b1], axis=1)                                # (128, 5)
    # Pad fc3 to 8 output rows: zero weights + very negative bias -> softmax == 0 there.
    w3p = jnp.concatenate([w3, jnp.zeros((5, w3.shape[1]), w3.dtype)], axis=0)   # (8, 64)
    b3p = jnp.concatenate([b3, jnp.full((5, 1), -1e9, b3.dtype)], axis=0)        # (8, 1)

    # Lane-dense batch tile: multiple of 128.  Clamp so small batches are not
    # over-padded and large batches keep >= 2 grid steps (v7x megacore).
    tile_b = max(128, (int(tile_b) // 128) * 128)
    tile_b = min(tile_b, max(128, pl.cdiv(pl.cdiv(B, 2), 128) * 128))
    n_tiles = pl.cdiv(B, tile_b)
    b_pad = n_tiles * tile_b

    # Feature-major input with the folded-bias ones row; single fused pad-of-transpose.
    xt = jnp.concatenate([x.T, jnp.ones((1, B), x.dtype)], axis=0)         # (5, B)
    xt = jnp.pad(xt, ((0, 0), (0, b_pad - B)))                             # (5, b_pad)

    # bf16 on the MXU inputs (accumulation stays f32 inside the kernel).
    xt = xt.astype(jnp.bfloat16)
    w1a = w1a.astype(jnp.bfloat16)
    w2b = w2.astype(jnp.bfloat16)
    w3p = w3p.astype(jnp.bfloat16)

    full = lambda a: pl.BlockSpec(a.shape, lambda i: (0,) * a.ndim)

    out_t = pl.pallas_call(
        meteo_kernel,
        out_shape=jax.ShapeDtypeStruct((8, b_pad), jnp.float32),
        grid_spec=pltpu.PrefetchScalarGridSpec(
            num_scalar_prefetch=0,
            grid=(n_tiles,),
            in_specs=[
                pl.BlockSpec((5, tile_b), lambda i: (0, i)),     # x tile (batch on lanes)
                full(w1a), full(w2b), full(b2), full(w3p), full(b3p),
            ],
            out_specs=pl.BlockSpec((8, tile_b), lambda i: (0, i)),
        ),
        compiler_params=pltpu.CompilerParams(
            dimension_semantics=("parallel",),
            vmem_limit_bytes=32 << 20,      # safe on v5e/v6e/v7x for tile_b <= 2048
        ),
    )(xt, w1a, w2b, b2, w3p, b3p)

    return out_t[:3, :B].T                                       # back to (B, 3)


def init_params(key):
    """PyTorch nn.Linear-style init; weights stored [out, in], biases [out, 1]."""
    def linear(key, fan_in, fan_out):
        kw, kb = jax.random.split(key)
        bound = 1.0 / (fan_in ** 0.5)
        w = jax.random.uniform(kw, (fan_out, fan_in), jnp.float32, -bound, bound)
        b = jax.random.uniform(kb, (fan_out, 1), jnp.float32, -bound, bound)
        return w, b

    k1, k2, k3 = jax.random.split(key, 3)
    w1, b1 = linear(k1, 4, 128)
    w2, b2 = linear(k2, 128, 64)
    w3, b3 = linear(k3, 64, 3)
    return (w1, b1, w2, b2, w3, b3)


def reference_forward(x, params):
    """Pure-JAX f32 reference of the eval-mode PyTorch forward ([B, F] layout)."""
    w1, b1, w2, b2, w3, b3 = params
    h1 = jnp.maximum(x @ w1.T + b1[:, 0], 0.0)
    h2 = jnp.maximum(h1 @ w2.T + b2[:, 0], 0.0)
    logits = h2 @ w3.T + b3[:, 0]
    return jax.nn.softmax(logits, axis=1)


if __name__ == "__main__":
    key = jax.random.PRNGKey(0)
    kx, kp = jax.random.split(key)

    B = 16  # small batch; wrapper pads to the lane-dense tile and slices back
    x = jax.random.normal(kx, (B, 4), dtype=jnp.float32)
    params = init_params(kp)

    out = meteo_forward(x, params)
    out = jax.block_until_ready(out)

    ref = reference_forward(x, params)
    assert out.shape == (B, 3)
    # bf16 MXU inputs vs. the f32 reference -> loose value tolerance ...
    assert jnp.allclose(out, ref, atol=2e-2, rtol=2e-2), "mismatch vs JAX reference"
    # ... but the softmax normalization is exact, so rows sum to 1 tightly.
    assert jnp.allclose(jnp.sum(out, axis=1), jnp.ones((B,)), atol=1e-4)

    print("KERNEL_OK")
</pallas_src>

<mosaic_0001>
module attributes {stable_mosaic.version = 11 : i64} {
  func.func @meteo_kernel(%arg0: i32, %arg1: memref<5x128xbf16, #tpu.memory_space<vmem>>, %arg2: memref<128x5xbf16, #tpu.memory_space<vmem>>, %arg3: memref<64x128xbf16, #tpu.memory_space<vmem>>, %arg4: memref<64x1xf32, #tpu.memory_space<vmem>>, %arg5: memref<8x64xbf16, #tpu.memory_space<vmem>>, %arg6: memref<8x1xf32, #tpu.memory_space<vmem>>, %arg7: memref<8x128xf32, #tpu.memory_space<vmem>>) attributes {dimension_semantics = [#tpu.dimension_semantics<parallel>], iteration_bounds = array<i64: 1>, scalar_prefetch = 0 : i64, scratch_operands = 0 : i64, tpu.core_type = #tpu.core_type<tc>, window_params = [{transform_indices = @transform_0, window_bounds = array<i64: 5, 128>}, {pipeline_mode = #tpu.pipeline_mode<synchronous>, transform_indices = @transform_1, window_bounds = array<i64: 128, 5>}, {pipeline_mode = #tpu.pipeline_mode<synchronous>, transform_indices = @transform_2, window_bounds = array<i64: 64, 128>}, {pipeline_mode = #tpu.pipeline_mode<synchronous>, transform_indices = @transform_3, window_bounds = array<i64: 64, 1>}, {pipeline_mode = #tpu.pipeline_mode<synchronous>, transform_indices = @transform_4, window_bounds = array<i64: 8, 64>}, {pipeline_mode = #tpu.pipeline_mode<synchronous>, transform_indices = @transform_5, window_bounds = array<i64: 8, 1>}, {transform_indices = @transform_6, window_bounds = array<i64: 8, 128>}]} {
    %c0 = arith.constant 0 : index
    %c0_0 = arith.constant 0 : index
    %0 = vector.load %arg1[%c0, %c0_0] : memref<5x128xbf16, #tpu.memory_space<vmem>>, vector<5x128xbf16>
    %c0_1 = arith.constant 0 : index
    %c0_2 = arith.constant 0 : index
    %1 = vector.load %arg2[%c0_1, %c0_2] : memref<128x5xbf16, #tpu.memory_space<vmem>>, vector<128x5xbf16>
    %cst = arith.constant dense<0.000000e+00> : vector<128x128xf32>
    %2 = tpu.matmul %1, %0, %cst {dimension_numbers = #tpu.dot_dimension_numbers<[1], [0], [0], [1], [0, 0, 1, 1], [], []>} : vector<128x5xbf16>, vector<5x128xbf16>, vector<128x128xf32> -> vector<128x128xf32>
    %cst_3 = arith.constant 0.000000e+00 : f32
    %3 = vector.broadcast %cst_3 : f32 to vector<128x128xf32>
    %4 = arith.maximumf %2, %3 : vector<128x128xf32>
    %5 = arith.truncf %4 : vector<128x128xf32> to vector<128x128xbf16>
    %c0_4 = arith.constant 0 : index
    %c0_5 = arith.constant 0 : index
    %6 = vector.load %arg3[%c0_4, %c0_5] : memref<64x128xbf16, #tpu.memory_space<vmem>>, vector<64x128xbf16>
    %cst_6 = arith.constant dense<0.000000e+00> : vector<64x128xf32>
    %7 = tpu.matmul %6, %5, %cst_6 {dimension_numbers = #tpu.dot_dimension_numbers<[1], [0], [0], [1], [0, 0, 1, 1], [], []>} : vector<64x128xbf16>, vector<128x128xbf16>, vector<64x128xf32> -> vector<64x128xf32>
    %c0_7 = arith.constant 0 : index
    %c0_8 = arith.constant 0 : index
    %8 = vector.load %arg4[%c0_7, %c0_8] : memref<64x1xf32, #tpu.memory_space<vmem>>, vector<64x1xf32>
    %9 = vector.broadcast %8 : vector<64x1xf32> to vector<64x128xf32>
    %10 = arith.addf %7, %9 : vector<64x128xf32>
    %cst_9 = arith.constant 0.000000e+00 : f32
    %11 = vector.broadcast %cst_9 : f32 to vector<64x128xf32>
    %12 = arith.maximumf %10, %11 : vector<64x128xf32>
    %13 = arith.truncf %12 : vector<64x128xf32> to vector<64x128xbf16>
    %c0_10 = arith.constant 0 : index
    %c0_11 = arith.constant 0 : index
    %14 = vector.load %arg5[%c0_10, %c0_11] : memref<8x64xbf16, #tpu.memory_space<vmem>>, vector<8x64xbf16>
    %cst_12 = arith.constant dense<0.000000e+00> : vector<8x128xf32>
    %15 = tpu.matmul %14, %13, %cst_12 {dimension_numbers = #tpu.dot_dimension_numbers<[1], [0], [0], [1], [0, 0, 1, 1], [], []>} : vector<8x64xbf16>, vector<64x128xbf16>, vector<8x128xf32> -> vector<8x128xf32>
    %c0_13 = arith.constant 0 : index
    %c0_14 = arith.constant 0 : index
    %16 = vector.load %arg6[%c0_13, %c0_14] : memref<8x1xf32, #tpu.memory_space<vmem>>, vector<8x1xf32>
    %17 = vector.broadcast %16 : vector<8x1xf32> to vector<8x128xf32>
    %18 = arith.addf %15, %17 : vector<8x128xf32>
    %cst_15 = arith.constant dense<0xFF800000> : vector<128xf32>
    %19 = vector.multi_reduction <maximumf>, %18, %cst_15 [0] : vector<8x128xf32> to vector<128xf32>
    %20 = vector.shape_cast %19 : vector<128xf32> to vector<1x128xf32>
    %21 = vector.broadcast %20 : vector<1x128xf32> to vector<8x128xf32>
    %22 = arith.subf %18, %21 : vector<8x128xf32>
    %23 = math.exp %22 : vector<8x128xf32>
    %cst_16 = arith.constant dense<0.000000e+00> : vector<128xf32>
    %24 = vector.multi_reduction <add>, %23, %cst_16 [0] : vector<8x128xf32> to vector<128xf32>
    %25 = vector.shape_cast %24 : vector<128xf32> to vector<1x128xf32>
    %26 = tpu.reciprocal %25 : vector<1x128xf32> -> vector<1x128xf32>
    %27 = vector.broadcast %26 : vector<1x128xf32> to vector<8x128xf32>
    %28 = arith.mulf %23, %27 : vector<8x128xf32>
    %c0_17 = arith.constant 0 : index
    %c0_18 = arith.constant 0 : index
    %29 = vector.load %arg7[%c0_17, %c0_18] : memref<8x128xf32, #tpu.memory_space<vmem>>, vector<8x128xf32>
    tpu.vector_store %arg7[%c0_17, %c0_18], %28 {strides = array<i32>} : memref<8x128xf32, #tpu.memory_space<vmem>>, vector<8x128xf32>,
    return
  }
  func.func @transform_0(%arg0: i32) -> (i32, i32) {
    %c0_i32 = arith.constant 0 : i32
    %c0_i32_0 = arith.constant 0 : i32
    return %c0_i32, %arg0 : i32, i32
  }
  func.func @transform_1(%arg0: i32) -> (i32, i32) {
    %c0_i32 = arith.constant 0 : i32
    %c0_i32_0 = arith.constant 0 : i32
    %c0_i32_1 = arith.constant 0 : i32
    return %c0_i32, %c0_i32_0 : i32, i32
  }
  func.func @transform_2(%arg0: i32) -> (i32, i32) {
    %c0_i32 = arith.constant 0 : i32
    %c0_i32_0 = arith.constant 0 : i32
    %c0_i32_1 = arith.constant 0 : i32
    return %c0_i32, %c0_i32_0 : i32, i32
  }
  func.func @transform_3(%arg0: i32) -> (i32, i32) {
    %c0_i32 = arith.constant 0 : i32
    %c0_i32_0 = arith.constant 0 : i32
    %c0_i32_1 = arith.constant 0 : i32
    return %c0_i32, %c0_i32_0 : i32, i32
  }
  func.func @transform_4(%arg0: i32) -> (i32, i32) {
    %c0_i32 = arith.constant 0 : i32
    %c0_i32_0 = arith.constant 0 : i32
    %c0_i32_1 = arith.constant 0 : i32
    return %c0_i32, %c0_i32_0 : i32, i32
  }
  func.func @transform_5(%arg0: i32) -> (i32, i32) {
    %c0_i32 = arith.constant 0 : i32
    %c0_i32_0 = arith.constant 0 : i32
    %c0_i32_1 = arith.constant 0 : i32
    return %c0_i32, %c0_i32_0 : i32, i32
  }
  func.func @transform_6(%arg0: i32) -> (i32, i32) {
    %c0_i32 = arith.constant 0 : i32
    %c0_i32_0 = arith.constant 0 : i32
    return %c0_i32, %arg0 : i32, i32
  }
}

</mosaic_0001>

<bundles_post_ra>
// kernel: tpu_custom_call.1
= control target key start
LH: loop header
LB: loop body
LE: loop exit
PB: predicated region body
PF: predicated region fallthrough
CT: control target
= control target key end

     0   :  { %vm107_vm0 = vcmask 1041408   ;;  %vm108_vm1 = vcmask 1042432   ;;  %v493_v1 = vmov 65535   ;;  %s609_s0 = inlined_call_operand.vmem [shape: bf16[5,128], index: 0, kind: input, shape index: {}]   ;;  %s610_s1 = inlined_call_operand.vmem [shape: bf16[128,5], index: 1, kind: input, shape index: {}]   ;;  %s611_s2 = inlined_call_operand.vmem [shape: bf16[64,128], index: 2, kind: input, shape index: {}]   ;;  %s612_s3 = inlined_call_operand.vmem [shape: f32[64,1], index: 3, kind: input, shape index: {}]   ;;  %s613_s4 = inlined_call_operand.vmem [shape: bf16[8,64], index: 4, kind: input, shape index: {}]   ;;  %s614_s5 = inlined_call_operand.vmem [shape: f32[8,1], index: 5, kind: input, shape index: {}]   ;;  %s615_s6 = inlined_call_operand.hbm [shape: f32[8,128], index: 6, kind: output, shape index: {}]  }
   0x1   :  { %v25_v0 = vld [vmem:[%s609_s0] sm:$0x7]  ;;  %v109_v2 = vsel %vm107_vm0, 4294967295, %v493_v1 }
   0x2   :  { %v110_v3 = vsel %vm108_vm1, %v109_v2, 0 }
   0x3   :  { %11 = vsyncpa [#allocation3], 0  ;;  %v112_v4 = vand.u32 %v110_v3, %v25_v0  ;;  %v440_v5 = vld [vmem:[%s610_s1 + $0x20] sm:$0xff]  ;;  %vm82_vm2 = vcmask 39936   ;;  %v441_v7 = vld [vmem:[%s610_s1 + $0x28] sm:$0xff]  ;;  %v494_v27 = vmov 0  }
   0x4   :  { %v436_v6 = vld [vmem:[%s610_s1] sm:$0xff]  ;;  %v437_v8 = vld [vmem:[%s610_s1 + $0x8] sm:$0xff]  ;;  %v442_v9 = vld [vmem:[%s610_s1 + $0x30] sm:$0xff]  ;;  %460 = vset.pattern.permute.xlu0 %v494_v27  ;;  %461 = vset.pattern.permute.xlu1 %v494_v27  ;;  %vm315_vm3 = vcmask 523264  }
   0x5   :  { %448 = vmatpush.bf16.msra.mxu3 %v112_v4  ;;  %121 = vmatpush.bf16.msra.mxu0 %v112_v4  ;;  %v438_v10 = vld [vmem:[%s610_s1 + $0x10] sm:$0xff]  ;;  %v443_v11 = vld [vmem:[%s610_s1 + $0x38] sm:$0xff]  ;;  %v199_v35 = vld [vmem:[%s612_s3 + $0x20] sm:$0xff] }
   0x6   :  { %v439_v12 = vld [vmem:[%s610_s1 + $0x18] sm:$0xff]  ;;  %v201_v26 = vld [vmem:[%s612_s3 + $0x30] sm:$0xff]  ;;  %462 = vset.pattern.permute.xlu2 %v494_v27  ;;  %225 = vperm.xlu1 %461, %v199_v35   ;;  %v200_v42 = vld [vmem:[%s612_s3 + $0x28] sm:$0xff]  ;;  %s370_s1 = sshll.u32 %s615_s6, 4  ;;  %s371_s1 = int_to_ptr.hbm [resolvable:$true] %s370_s1 }
   0x7   :  { %235 = vperm.xlu0 %460, %v201_v26   ;;  %v202_v34 = vld [vmem:[%s612_s3 + $0x38] sm:$0xff]  ;;  %v195_v44 = vld [vmem:[%s612_s3] sm:$0xff]  ;;  %v196_v52 = vld [vmem:[%s612_s3 + $0x8] sm:$0xff] }
   0x8   :  { %415 = vmatmul.msk.bf16.vlgmr.msra.gmra.mxu3 %vm82_vm2, %v440_v5  ;;  %411 = vmatmul.msk.bf16.vlgmr.msra.gmra.mxu0 %vm82_vm2, %v436_v6  ;;  %v444_v60 = vld [vmem:[%s611_s2] sm:$0xff]  ;;  %v447_v61 = vld [vmem:[%s611_s2 + $0x18] sm:$0xff]  ;;  %v197_v62 = vld [vmem:[%s612_s3 + $0x10] sm:$0xff] }
   0x9   :  { %215 = vperm.xlu2 %462, %v197_v62   ;;  %v198_v63 = vld [vmem:[%s612_s3 + $0x18] sm:$0xff]  ;;  %v445_v0 = vld [vmem:[%s611_s2 + $0x8] sm:$0xff]  ;;  %v309_v1 = vld [vmem:[%s614_s5] sm:$0xff] }
   0xa   :  { %v446_v2 = vld [vmem:[%s611_s2 + $0x10] sm:$0xff] }
   0xe   :  { %230 = vperm.xlu1 %461, %v200_v42  }
   0xf   :  { %240 = vperm.xlu0 %460, %v202_v34  }
  0x11   :  { %220 = vperm.xlu2 %462, %v198_v63  }
  0x16   :  { %210 = vperm.xlu1 %461, %v196_v52  }
  0x17   :  { %205 = vperm.xlu0 %460, %v195_v44  }
  0x18   :  { %416 = vmatmul.msk.bf16.gmra.mxu3 %vm82_vm2, %v441_v7  ;;  %412 = vmatmul.msk.bf16.gmra.mxu0 %vm82_vm2, %v437_v8 }
  0x19   :  { %312 = vperm.xlu2 %462, %v309_v1  }
  0x28   :  { %417 = vmatmul.msk.bf16.gmra.mxu3 %vm82_vm2, %v442_v9  ;;  %413 = vmatmul.msk.bf16.gmra.mxu0 %vm82_vm2, %v438_v10 }
  0x38   :  { %418 = vmatmul.msk.bf16.gmra.mxu3 %vm82_vm2, %v443_v11  ;;  %414 = vmatmul.msk.bf16.gmra.mxu0 %vm82_vm2, %v439_v12 }
  0x79   :  { %v236_v4 = vpop.permute.xlu0 %235 }
  0x81   :  { %v241_v8 = vpop.permute.xlu0 %240 }
  0x85   :  { %v558_v13 = vpop.f32.mrf.mxu0 }
  0x86   :  { %v163_v56 = vmax.f32 %v558_v13, 0.0 }
  0x8b   :  { %v143_v14 = vpop.f32.mrf.mxu3 }
  0x8c   :  { %v171_v45 = vmax.f32 %v143_v14, 0.0 }
  0x8d   :  { %v560_v16 = vpop.f32.mrf.mxu0 }
  0x8e   :  { %v164_v57 = vmax.f32 %v560_v16, 0.0 }
  0x90   :  { %v179_v59 = vpack.c.bf16 %v164_v57, %v163_v56 }
  0x93   :  { %v145_v15 = vpop.f32.mrf.mxu3 }
  0x94   :  { %v172_v40 = vmax.f32 %v145_v15, 0.0  ;;  %v226_v15 = vpop.permute.xlu1 %225 }
  0x95   :  { %v128_v18 = vpop.f32.mrf.mxu0 }
  0x96   :  { %v183_v48 = vpack.c.bf16 %v172_v40, %v171_v45  ;;  %v165_v53 = vmax.f32 %v128_v18, 0.0 }
  0x9b   :  { %v148_v17 = vpop.f32.mrf.mxu3 }
  0x9c   :  { %v173_v39 = vmax.f32 %v148_v17, 0.0  ;;  %v216_v17 = vpop.permute.xlu2 %215  ;;  %v231_v18 = vpop.permute.xlu1 %230 }
  0x9d   :  { %v130_v20 = vpop.f32.mrf.mxu0 }
  0x9e   :  { %v166_v54 = vmax.f32 %v130_v20, 0.0 }
  0xa0   :  { %v180_v58 = vpack.c.bf16 %v166_v54, %v165_v53 }
  0xa3   :  { %v150_v19 = vpop.f32.mrf.mxu3 }
  0xa4   :  { %v174_v37 = vmax.f32 %v150_v19, 0.0  ;;  %v221_v20 = vpop.permute.xlu2 %220 }
  0xa5   :  { %v133_v22 = vpop.f32.mrf.mxu0 }
  0xa6   :  { %v184_v41 = vpack.c.bf16 %v174_v37, %v173_v39  ;;  %v167_v49 = vmax.f32 %v133_v22, 0.0  ;;  %v308_v39 = vld [vmem:[%s613_s4] sm:$0xf]  ;;  %s495_s4 = smov [#allocation2]  }
  0xa7   :  { %s368_s5 = sshll.u32 %s495_s4, 4  ;;  %s369_s5 = int_to_ptr.vmem [resolvable:$true] %s368_s5 }
  0xab   :  { %v153_v21 = vpop.f32.mrf.mxu3 }
  0xac   :  { %v175_v36 = vmax.f32 %v153_v21, 0.0  ;;  %v313_v40 = vpop.permute.xlu2 %312 }
  0xad   :  { %v135_v24 = vpop.f32.mrf.mxu0 }
  0xae   :  { %v168_v50 = vmax.f32 %v135_v24, 0.0 }
  0xb0   :  { %v181_v55 = vpack.c.bf16 %v168_v50, %v167_v49 }
  0xb3   :  { %v155_v23 = vpop.f32.mrf.mxu3 }
  0xb4   :  { %v176_v32 = vmax.f32 %v155_v23, 0.0 }
  0xb5   :  { %v138_v31 = vpop.f32.mrf.mxu0 }
  0xb6   :  { %v185_v38 = vpack.c.bf16 %v176_v32, %v175_v36  ;;  %v169_v46 = vmax.f32 %v138_v31, 0.0 }
  0xbb   :  { %v158_v25 = vpop.f32.mrf.mxu3 }
  0xbc   :  { %v177_v29 = vmax.f32 %v158_v25, 0.0  ;;  %v211_v25 = vpop.permute.xlu1 %210 }
  0xbd   :  { %v140_v43 = vpop.f32.mrf.mxu0 }
  0xbe   :  { %v170_v47 = vmax.f32 %v140_v43, 0.0 }
  0xc0   :  { %v182_v51 = vpack.c.bf16 %v170_v47, %v169_v46 }
  0xc3   :  { %v160_v28 = vpop.f32.mrf.mxu3 }
  0xc4   :  { %v178_v30 = vmax.f32 %v160_v28, 0.0 }
  0xc6   :  { %v186_v33 = vpack.c.bf16 %v178_v30, %v177_v29  ;;  %v206_v29 = vpop.permute.xlu0 %205 }
  0xc8   :  { %267 = vmatpush.bf16.msra.mxu1 %v186_v33  ;;  %449 = vmatpush.bf16.msra.mxu2 %v186_v33 }
  0xcc   :  { %268 = vmatpush.bf16.msra.mxu1 %v185_v38  ;;  %450 = vmatpush.bf16.msra.mxu2 %v185_v38 }
  0xd0   :  { %269 = vmatpush.bf16.msra.mxu1 %v184_v41  ;;  %451 = vmatpush.bf16.msra.mxu2 %v184_v41 }
  0xd4   :  { %270 = vmatpush.bf16.msra.mxu1 %v183_v48  ;;  %452 = vmatpush.bf16.msra.mxu2 %v183_v48 }
  0xd8   :  { %271 = vmatpush.bf16.msra.mxu1 %v182_v51  ;;  %453 = vmatpush.bf16.msra.mxu2 %v182_v51 }
  0xdc   :  { %272 = vmatpush.bf16.msra.mxu1 %v181_v55  ;;  %454 = vmatpush.bf16.msra.mxu2 %v181_v55 }
  0xe0   :  { %273 = vmatpush.bf16.msra.mxu1 %v180_v58  ;;  %455 = vmatpush.bf16.msra.mxu2 %v180_v58 }
  0xe4   :  { %274 = vmatpush.bf16.msra.mxu1 %v179_v59  ;;  %456 = vmatpush.bf16.msra.mxu2 %v179_v59 }
  0xe7   :  { %275 = vmatmul.bf16.vlgmr.msra.gmra.mxu1 %v444_v60  ;;  %290 = vmatmul.bf16.vlgmr.msra.gmra.mxu2 %v447_v61 }
  0xf7   :  { %280 = vmatmul.bf16.gmra.mxu1 %v445_v0 }
 0x107   :  { %285 = vmatmul.bf16.gmra.mxu1 %v446_v2 }
 0x164   :  { %v276_v3 = vpop.f32.mrf.mxu1 }
 0x165   :  { %v277_v33 = vadd.f32 %v276_v3, %v206_v29 }
 0x167   :  { %v296_v37 = vmax.f32 %v277_v33, 0.0 }
 0x16a   :  { %v291_v5 = vpop.f32.mrf.mxu2 }
 0x16b   :  { %v292_v7 = vadd.f32 %v291_v5, %v236_v4 }
 0x16c   :  { %v278_v6 = vpop.f32.mrf.mxu1 }
 0x16d   :  { %v302_v10 = vmax.f32 %v292_v7, 0.0  ;;  %v279_v30 = vadd.f32 %v278_v6, %v211_v25 }
 0x16f   :  { %v297_v35 = vmax.f32 %v279_v30, 0.0 }
 0x171   :  { %v304_v38 = vpack.c.bf16 %v297_v35, %v296_v37 }
 0x172   :  { %v293_v9 = vpop.f32.mrf.mxu2 }
 0x173   :  { %v294_v11 = vadd.f32 %v293_v9, %v241_v8 }
 0x174   :  { %v281_v12 = vpop.f32.mrf.mxu1 }
 0x175   :  { %v303_v13 = vmax.f32 %v294_v11, 0.0  ;;  %v282_v26 = vadd.f32 %v281_v12, %v216_v17 }
 0x177   :  { %v307_v14 = vpack.c.bf16 %v303_v13, %v302_v10  ;;  %v298_v34 = vmax.f32 %v282_v26, 0.0 }
 0x179   :  { %323 = vmatpush.bf16.msrb.mxu2 %v307_v14 }
 0x17c   :  { %v283_v16 = vpop.f32.mrf.mxu1 }
 0x17d   :  { %v284_v23 = vadd.f32 %v283_v16, %v221_v20 }
 0x17f   :  { %v299_v31 = vmax.f32 %v284_v23, 0.0 }
 0x181   :  { %v305_v36 = vpack.c.bf16 %v299_v31, %v298_v34 }
 0x184   :  { %v286_v19 = vpop.f32.mrf.mxu1 }
 0x185   :  { %v287_v21 = vadd.f32 %v286_v19, %v226_v15 }
 0x187   :  { %v300_v27 = vmax.f32 %v287_v21, 0.0 }
 0x18c   :  { %v288_v22 = vpop.f32.mrf.mxu1 }
 0x18d   :  { %v289_v24 = vadd.f32 %v288_v22, %v231_v18 }
 0x18f   :  { %v301_v28 = vmax.f32 %v289_v24, 0.0 }
 0x191   :  { %v306_v32 = vpack.c.bf16 %v301_v28, %v300_v27 }
 0x193   :  { %324 = vmatpush.bf16.msrb.mxu2 %v306_v32 }
 0x197   :  { %325 = vmatpush.bf16.msrb.mxu2 %v305_v36 }
 0x19b   :  { %326 = vmatpush.bf16.msrb.mxu2 %v304_v38 }
 0x19e   :  { %435 = vmatmul.msk.bf16.vlgmr.msrb.gmra.mxu2 %vm315_vm3, %v308_v39 }
 0x221   :  { %v328_v41 = vpop.f32.mrf.mxu2 }
 0x222   :  { %v329_v42 = vadd.f32 %v328_v41, %v313_v40 }
 0x224   :  { %v332_v43 = vrot.slane %v329_v42, 4 }
 0x226   :  { %v333_v44 = vmax.f32 %v329_v42, %v332_v43 }
 0x228   :  { %v334_v45 = vrot.slane %v333_v44, 2 }
 0x229   :  { %v330_v46 = vpop.f32.mrf.mxu2 }
 0x22a   :  { %v335_v47 = vmax.f32 %v333_v44, %v334_v45 }
 0x22c   :  { %v336_v48 = vrot.slane %v335_v47, 1 }
 0x22e   :  { %v337_v49 = vmax.f32 %v335_v47, %v336_v48 }
 0x230   :  { %v338_v50 = vsub.f32 %v329_v42, %v337_v49 }
 0x232   :  { %v339_v51 = vmul.f32 1.442695, %v338_v50 }
 0x234   :  { %463 = vpow2.f32 %v339_v51 }
 0x23a   :  { %v464_v52 = vpop.eup %463 }
 0x23b   :  { %v341_v53 = vrot.slane %v464_v52, 4 }
 0x23d   :  { %v342_v54 = vadd.f32 %v464_v52, %v341_v53 }
 0x23f   :  { %v343_v55 = vrot.slane %v342_v54, 2 }
 0x241   :  { %v344_v56 = vadd.f32 %v343_v55, %v342_v54 }
 0x243   :  { %v345_v57 = vrot.slane %v344_v56, 1 }
 0x245   :  { %v346_v58 = vadd.f32 %v345_v57, %v344_v56 }
 0x247   :  { %465 = vrcp.f32 %v346_v58  ;;  %v358_v62 = vand.u32 2147483648, %v346_v58  ;;  %v356_v0 = vand.u32 2147483647, %v346_v58  ;;  %vm352_vm5 = vweird.f32 %v346_v58 }
 0x249   :  { %v359_v2 = vor.u32 1.1754944e-38, %v358_v62  ;;  %vm357_vm7 = vcmp.eq.f32.partialorder %v356_v0, 8.507059e+37 }
 0x24d   :  { %v466_v59 = vpop.eup %465 }
 0x24e   :  { %v348_v60 = vmul.f32 %v466_v59, %v346_v58  ;;  %vm353_vm4 = vweird.f32 %v466_v59 }
 0x24f   :  { %vm354_vm6 = vmor %vm352_vm5, %vm353_vm4 }
 0x250   :  { %v349_v61 = vsub.f32 1.0, %v348_v60 }
 0x252   :  { %v350_v63 = vmul.f32 %v466_v59, %v349_v61 }
 0x254   :  { %v351_v1 = vadd.f32 %v466_v59, %v350_v63 }
 0x256   :  { %v355_v3 = vsel %vm354_vm6, %v466_v59, %v351_v1 }
 0x257   :  { %v360_v4 = vsel %vm357_vm7, %v359_v2, %v355_v3 }
 0x258   :  { %v361_v5 = vmul.f32 %v464_v52, %v360_v4 }
 0x25a   :  { %362 = vst [vmem:[#allocation2] sm:$0xff] %v361_v5 }
 0x25b   :  { %373 = dma.vmem_to_hbm [thread:$0]  %s369_s5, 128, %s371_s1, [#allocation3]  }
 0x25c   :  { %491 = dma.done.wait [#allocation3], 128  }
 0x25d   :  { %492 = vsyncadd [#allocation3], 4294967168 }
 0x25e   :  { %378 = vsyncpa [#allocation3], 1 }

</bundles_post_ra>
